<compile_context>
chip_gen: v7x
topology: tpu7x:2x2x1
jax: 0.10.0
libtpu: 0.0.40
codegen_flags: <defaults>
</compile_context>

<pallas_src>
import functools

import numpy as np

import jax
import jax.numpy as jnp
from jax.experimental import pallas as pl
from jax.experimental.pallas import tpu as pltpu


def _round_up(x: int, m: int) -> int:
    return ((x + m - 1) // m) * m


def _vmem_capacity_bytes() -> int:
    try:
        return int(pltpu.get_tpu_info().vmem_capacity_bytes)
    except Exception:  # pragma: no cover - conservative fallback
        return 64 * 1024 * 1024


def _bilinear_weight_matrix(out_size: int, in_size: int) -> np.ndarray:
    """Interpolation matrix (out_size, in_size) matching F.interpolate /
    kornia K.resize with mode='bilinear', align_corners=False (no antialias).
    Built in numpy so it is baked as a constant (no per-call device scatter)."""
    scale = in_size / out_size
    dst = np.arange(out_size, dtype=np.float64)
    src = (dst + 0.5) * scale - 0.5
    src = np.clip(src, 0.0, in_size - 1)
    lo = np.floor(src).astype(np.int64)
    hi = np.minimum(lo + 1, in_size - 1)
    frac = (src - lo).astype(np.float32)
    w = np.zeros((out_size, in_size), dtype=np.float32)
    rows = np.arange(out_size)
    w[rows, lo] += 1.0 - frac
    w[rows, hi] += frac
    return w


def _resize_kernel(wh_ref, wwT_ref, x_ref, o_ref, *scratch,
                   src_h, tile_h, ragged_h, acc_in_out):
    # wh_ref : (out_h, tile_h)        f32  H-tile of the row-interp matrix
    # wwT_ref: (W, out_w_pad)         f32  shared / constant across the grid
    # x_ref  : (B, tile_h, W)         input dtype (cast to f32 in-kernel)
    # o_ref  : (B, out_h, out_w_pad)  resident across the h reduction axis
    # scratch: optional f32 accumulator, only when the output dtype is not f32
    hi = pl.program_id(1)
    acc_ref = o_ref if acc_in_out else scratch[0]

    @pl.when(hi == 0)
    def _init():
        acc_ref[...] = jnp.zeros_like(acc_ref)

    wh = wh_ref[...]
    wwT = wwT_ref[...]

    if ragged_h:
        # The last H tile reads past the real H; those rows are *undefined*
        # (possibly NaN/Inf), so zero them explicitly before the matmul.
        rows = hi * tile_h + jax.lax.broadcasted_iota(
            jnp.int32, (tile_h, x_ref.shape[2]), 0)
        valid = rows < src_h

    bsz = x_ref.shape[0]
    # Static per-plane loop (B <= 16): both matmuls per iteration keep live
    # ranges short; width pass feeds the height pass while the next plane's
    # data is already in VMEM.
    for b in range(bsz):
        xb = x_ref[b].astype(jnp.float32)                       # (tile_h, W)
        if ragged_h:
            xb = jnp.where(valid, xb, 0.0)
        part = jnp.dot(xb, wwT, preferred_element_type=jnp.float32)
        acc_ref[b] += jnp.dot(wh, part, preferred_element_type=jnp.float32)

    if not acc_in_out:
        @pl.when(hi == pl.num_programs(1) - 1)
        def _store():
            o_ref[...] = acc_ref[...].astype(o_ref.dtype)


@functools.partial(jax.jit, static_argnames=("size",))
def xray_resize(x: jnp.ndarray, size: int) -> jnp.ndarray:
    """Pallas TPU implementation of XRayResizer.forward.

    x: (N, C, H, W) float array. Returns (N, C, size, size)
    (square output, matching the X-ray preprocessing use of K.resize).
    """
    assert x.ndim == 4, x.shape
    N, C, H, W = map(int, x.shape)
    out_h = out_w = int(size)

    in_isz = jnp.dtype(x.dtype).itemsize
    out_isz = in_isz
    acc_in_out = jnp.dtype(x.dtype) == jnp.dtype(jnp.float32)

    # ---- H tiling (no input padding: ragged tail is masked in-kernel) -----
    out_w_pad = _round_up(out_w, 128)      # lane-dense (unmasked) output stores
    if H <= 512:
        th, n_h = H, 1                     # single tile: block dim == full dim
    else:
        th = 256                           # multiple of (8, 128)
        n_h = (H + th - 1) // th
    ragged_h = (H % th) != 0

    # ---- plane grouping: B must divide P; keep >= 2 (even) plane groups ----
    P = N * C
    vmem_cap = _vmem_capacity_bytes()
    budget = int(vmem_cap * 0.75)          # headroom for compiler scratch etc.

    def vmem_needed(b: int) -> int:
        return (
            2 * b * th * W * in_isz                               # x blocks (x2)
            + 2 * out_h * th * 4                                  # Wh blocks
            + 2 * W * out_w_pad * 4                               # Ww^T blocks
            + 2 * b * out_h * out_w_pad * out_isz                 # output blocks
            + (0 if acc_in_out else b * out_h * out_w_pad * 4)    # f32 scratch
            + th * W * 4 + th * out_w_pad * 4                     # temporaries
        )

    max_unroll = 16
    divisors = sorted({d for i in range(1, int(P ** 0.5) + 1) if P % i == 0
                       for d in (i, P // i)})
    fitting = [d for d in divisors if d <= max_unroll and vmem_needed(d) <= budget]
    if not fitting:
        fitting = [1]
    even_groups = [d for d in fitting if P // d >= 2 and (P // d) % 2 == 0]
    multi_groups = [d for d in fitting if P // d >= 2]
    if even_groups:        # >= 2 balanced groups -> both v7x TCs busy
        B = max(even_groups)
    elif multi_groups:
        B = max(multi_groups)
    else:                  # P == 1: single group (one v7x core idle)
        B = max(fitting)
    G = P // B

    # ---- weights (small, numpy-built constants; zero-padded tails) --------
    wh = _bilinear_weight_matrix(out_h, H)                        # (out_h, H)
    if n_h * th != H:
        wh = np.pad(wh, ((0, 0), (0, n_h * th - H)))
    wwT = _bilinear_weight_matrix(out_w, W).T                     # (W, out_w)
    if out_w_pad != out_w:
        wwT = np.pad(wwT, ((0, 0), (0, out_w_pad - out_w)))
    wh = jnp.asarray(wh, dtype=jnp.float32)
    wwT = jnp.asarray(wwT, dtype=jnp.float32)

    x_flat = x.reshape(P, H, W)        # merges leading dims only -> no HBM copy

    vmem_limit = int(min(int(vmem_cap * 0.85),
                         max(vmem_needed(B) * 5 // 4, 16 * 1024 * 1024)))

    kernel = functools.partial(_resize_kernel, src_h=H, tile_h=th,
                               ragged_h=ragged_h, acc_in_out=acc_in_out)
    scratch_shapes = ([] if acc_in_out
                      else [pltpu.VMEM((B, out_h, out_w_pad), jnp.float32)])

    out_flat = pl.pallas_call(
        kernel,
        out_shape=jax.ShapeDtypeStruct((P, out_h, out_w_pad), x.dtype),
        grid_spec=pltpu.PrefetchScalarGridSpec(
            num_scalar_prefetch=0,
            grid=(G, n_h),                                  # planes, H reduction
            in_specs=[
                pl.BlockSpec((out_h, th), lambda p, h: (0, h)),      # Wh tile
                pl.BlockSpec((W, out_w_pad), lambda p, h: (0, 0)),   # Ww^T
                pl.BlockSpec((B, th, W), lambda p, h: (p, h, 0)),    # image rows
            ],
            out_specs=pl.BlockSpec((B, out_h, out_w_pad), lambda p, h: (p, 0, 0)),
            scratch_shapes=scratch_shapes,
        ),
        compiler_params=pltpu.CompilerParams(
            dimension_semantics=("parallel", "arbitrary"),
            vmem_limit_bytes=vmem_limit,
        ),
    )(wh, wwT, x_flat)

    out = out_flat if out_w_pad == out_w else out_flat[:, :, :out_w]
    return out.reshape(N, C, out_h, out_w)


def _reference_resize(x: jnp.ndarray, size: int) -> jnp.ndarray:
    """Pure-JAX f32 bilinear resize (align_corners=False) for verification."""
    _, _, H, W = x.shape
    wh = jnp.asarray(_bilinear_weight_matrix(size, H))
    ww = jnp.asarray(_bilinear_weight_matrix(size, W))
    return jnp.einsum("oh,nchw,pw->ncop", wh, x.astype(jnp.float32), ww).astype(x.dtype)


if __name__ == "__main__":
    key = jax.random.PRNGKey(0)
    N, C, H, W = 2, 4, 16, 16
    size = 8
    x = jax.random.uniform(key, (N, C, H, W), dtype=jnp.float32)

    out = xray_resize(x, size)
    out = jax.block_until_ready(out)

    ref = _reference_resize(x, size)
    assert out.shape == (N, C, size, size), out.shape
    assert jnp.allclose(out, ref, atol=2e-2), float(jnp.max(jnp.abs(out - ref)))
    print("KERNEL_OK")
</pallas_src>

<mosaic_0001>
module attributes {stable_mosaic.version = 11 : i64} {
  func.func @_resize_kernel(%arg0: i32, %arg1: i32, %arg2: memref<8x16xf32, #tpu.memory_space<vmem>>, %arg3: memref<16x128xf32, #tpu.memory_space<vmem>>, %arg4: memref<4x16x16xf32, #tpu.memory_space<vmem>>, %arg5: memref<4x8x128xf32, #tpu.memory_space<vmem>>) attributes {dimension_semantics = [#tpu.dimension_semantics<parallel>, #tpu.dimension_semantics<arbitrary>], iteration_bounds = array<i64: 2, 1>, scalar_prefetch = 0 : i64, scratch_operands = 0 : i64, tpu.core_type = #tpu.core_type<tc>, window_params = [{transform_indices = @transform_0, window_bounds = array<i64: 8, 16>}, {pipeline_mode = #tpu.pipeline_mode<synchronous>, transform_indices = @transform_1, window_bounds = array<i64: 16, 128>}, {transform_indices = @transform_2, window_bounds = array<i64: 4, 16, 16>}, {transform_indices = @transform_3, window_bounds = array<i64: 4, 8, 128>}]} {
    %c0_i32 = arith.constant 0 : i32
    %0 = arith.cmpi eq, %arg1, %c0_i32 : i32
    %1 = arith.extui %0 : i1 to i32
    %c0_i32_0 = arith.constant 0 : i32
    %2 = arith.cmpi ne, %1, %c0_i32_0 : i32
    scf.if %2 {
      %cst_44 = arith.constant 0.000000e+00 : f32
      %45 = vector.broadcast %cst_44 : f32 to vector<4x8x128xf32>
      %c0_45 = arith.constant 0 : index
      %c0_46 = arith.constant 0 : index
      %c0_47 = arith.constant 0 : index
      %46 = vector.load %arg5[%c0_45, %c0_46, %c0_47] : memref<4x8x128xf32, #tpu.memory_space<vmem>>, vector<4x8x128xf32>
      tpu.vector_store %arg5[%c0_45, %c0_46, %c0_47], %45 {strides = array<i32>} : memref<4x8x128xf32, #tpu.memory_space<vmem>>, vector<4x8x128xf32>,
    } else {
    }
    %c0 = arith.constant 0 : index
    %c0_1 = arith.constant 0 : index
    %3 = vector.load %arg2[%c0, %c0_1] : memref<8x16xf32, #tpu.memory_space<vmem>>, vector<8x16xf32>
    %c0_2 = arith.constant 0 : index
    %c0_3 = arith.constant 0 : index
    %4 = vector.load %arg3[%c0_2, %c0_3] : memref<16x128xf32, #tpu.memory_space<vmem>>, vector<16x128xf32>
    %c0_4 = arith.constant 0 : index
    %c0_5 = arith.constant 0 : index
    %c0_6 = arith.constant 0 : index
    %5 = vector.load %arg4[%c0_4, %c0_5, %c0_6] : memref<4x16x16xf32, #tpu.memory_space<vmem>>, vector<1x16x16xf32>
    %6 = vector.shape_cast %5 : vector<1x16x16xf32> to vector<16x16xf32>
    %cst = arith.constant dense<0.000000e+00> : vector<16x128xf32>
    %7 = tpu.matmul %6, %4, %cst {dimension_numbers = #tpu.dot_dimension_numbers<[1], [0], [0], [1], [0, 0, 1, 1], [], []>} : vector<16x16xf32>, vector<16x128xf32>, vector<16x128xf32> -> vector<16x128xf32>
    %c0_7 = arith.constant 0 : index
    %c0_8 = arith.constant 0 : index
    %c0_9 = arith.constant 0 : index
    %8 = vector.load %arg5[%c0_7, %c0_8, %c0_9] : memref<4x8x128xf32, #tpu.memory_space<vmem>>, vector<1x8x128xf32>
    %9 = vector.shape_cast %8 : vector<1x8x128xf32> to vector<8x128xf32>
    %cst_10 = arith.constant dense<0.000000e+00> : vector<8x128xf32>
    %10 = tpu.matmul %3, %7, %cst_10 {dimension_numbers = #tpu.dot_dimension_numbers<[1], [0], [0], [1], [0, 0, 1, 1], [], []>} : vector<8x16xf32>, vector<16x128xf32>, vector<8x128xf32> -> vector<8x128xf32>
    %11 = arith.addf %9, %10 : vector<8x128xf32>
    %c0_11 = arith.constant 0 : index
    %c0_12 = arith.constant 0 : index
    %c0_13 = arith.constant 0 : index
    %12 = vector.load %arg5[%c0_11, %c0_12, %c0_13] : memref<4x8x128xf32, #tpu.memory_space<vmem>>, vector<1x8x128xf32>
    %13 = vector.shape_cast %12 : vector<1x8x128xf32> to vector<8x128xf32>
    %14 = vector.shape_cast %11 : vector<8x128xf32> to vector<1x8x128xf32>
    tpu.vector_store %arg5[%c0_11, %c0_12, %c0_13], %14 {strides = array<i32>} : memref<4x8x128xf32, #tpu.memory_space<vmem>>, vector<1x8x128xf32>,
    %c1 = arith.constant 1 : index
    %c0_14 = arith.constant 0 : index
    %c0_15 = arith.constant 0 : index
    %15 = vector.load %arg4[%c1, %c0_14, %c0_15] : memref<4x16x16xf32, #tpu.memory_space<vmem>>, vector<1x16x16xf32>
    %16 = vector.shape_cast %15 : vector<1x16x16xf32> to vector<16x16xf32>
    %cst_16 = arith.constant dense<0.000000e+00> : vector<16x128xf32>
    %17 = tpu.matmul %16, %4, %cst_16 {dimension_numbers = #tpu.dot_dimension_numbers<[1], [0], [0], [1], [0, 0, 1, 1], [], []>} : vector<16x16xf32>, vector<16x128xf32>, vector<16x128xf32> -> vector<16x128xf32>
    %c1_17 = arith.constant 1 : index
    %c0_18 = arith.constant 0 : index
    %c0_19 = arith.constant 0 : index
    %18 = vector.load %arg5[%c1_17, %c0_18, %c0_19] : memref<4x8x128xf32, #tpu.memory_space<vmem>>, vector<1x8x128xf32>
    %19 = vector.shape_cast %18 : vector<1x8x128xf32> to vector<8x128xf32>
    %cst_20 = arith.constant dense<0.000000e+00> : vector<8x128xf32>
    %20 = tpu.matmul %3, %17, %cst_20 {dimension_numbers = #tpu.dot_dimension_numbers<[1], [0], [0], [1], [0, 0, 1, 1], [], []>} : vector<8x16xf32>, vector<16x128xf32>, vector<8x128xf32> -> vector<8x128xf32>
    %21 = arith.addf %19, %20 : vector<8x128xf32>
    %c1_21 = arith.constant 1 : index
    %c0_22 = arith.constant 0 : index
    %c0_23 = arith.constant 0 : index
    %22 = vector.load %arg5[%c1_21, %c0_22, %c0_23] : memref<4x8x128xf32, #tpu.memory_space<vmem>>, vector<1x8x128xf32>
    %23 = vector.shape_cast %22 : vector<1x8x128xf32> to vector<8x128xf32>
    %24 = vector.shape_cast %21 : vector<8x128xf32> to vector<1x8x128xf32>
    tpu.vector_store %arg5[%c1_21, %c0_22, %c0_23], %24 {strides = array<i32>} : memref<4x8x128xf32, #tpu.memory_space<vmem>>, vector<1x8x128xf32>,
    %c2 = arith.constant 2 : index
    %c0_24 = arith.constant 0 : index
    %c0_25 = arith.constant 0 : index
    %25 = vector.load %arg4[%c2, %c0_24, %c0_25] : memref<4x16x16xf32, #tpu.memory_space<vmem>>, vector<1x16x16xf32>
    %26 = vector.shape_cast %25 : vector<1x16x16xf32> to vector<16x16xf32>
    %cst_26 = arith.constant dense<0.000000e+00> : vector<16x128xf32>
    %27 = tpu.matmul %26, %4, %cst_26 {dimension_numbers = #tpu.dot_dimension_numbers<[1], [0], [0], [1], [0, 0, 1, 1], [], []>} : vector<16x16xf32>, vector<16x128xf32>, vector<16x128xf32> -> vector<16x128xf32>
    %c2_27 = arith.constant 2 : index
    %c0_28 = arith.constant 0 : index
    %c0_29 = arith.constant 0 : index
    %28 = vector.load %arg5[%c2_27, %c0_28, %c0_29] : memref<4x8x128xf32, #tpu.memory_space<vmem>>, vector<1x8x128xf32>
    %29 = vector.shape_cast %28 : vector<1x8x128xf32> to vector<8x128xf32>
    %cst_30 = arith.constant dense<0.000000e+00> : vector<8x128xf32>
    %30 = tpu.matmul %3, %27, %cst_30 {dimension_numbers = #tpu.dot_dimension_numbers<[1], [0], [0], [1], [0, 0, 1, 1], [], []>} : vector<8x16xf32>, vector<16x128xf32>, vector<8x128xf32> -> vector<8x128xf32>
    %31 = arith.addf %29, %30 : vector<8x128xf32>
    %c2_31 = arith.constant 2 : index
    %c0_32 = arith.constant 0 : index
    %c0_33 = arith.constant 0 : index
    %32 = vector.load %arg5[%c2_31, %c0_32, %c0_33] : memref<4x8x128xf32, #tpu.memory_space<vmem>>, vector<1x8x128xf32>
    %33 = vector.shape_cast %32 : vector<1x8x128xf32> to vector<8x128xf32>
    %34 = vector.shape_cast %31 : vector<8x128xf32> to vector<1x8x128xf32>
    tpu.vector_store %arg5[%c2_31, %c0_32, %c0_33], %34 {strides = array<i32>} : memref<4x8x128xf32, #tpu.memory_space<vmem>>, vector<1x8x128xf32>,
    %c3 = arith.constant 3 : index
    %c0_34 = arith.constant 0 : index
    %c0_35 = arith.constant 0 : index
    %35 = vector.load %arg4[%c3, %c0_34, %c0_35] : memref<4x16x16xf32, #tpu.memory_space<vmem>>, vector<1x16x16xf32>
    %36 = vector.shape_cast %35 : vector<1x16x16xf32> to vector<16x16xf32>
    %cst_36 = arith.constant dense<0.000000e+00> : vector<16x128xf32>
    %37 = tpu.matmul %36, %4, %cst_36 {dimension_numbers = #tpu.dot_dimension_numbers<[1], [0], [0], [1], [0, 0, 1, 1], [], []>} : vector<16x16xf32>, vector<16x128xf32>, vector<16x128xf32> -> vector<16x128xf32>
    %c3_37 = arith.constant 3 : index
    %c0_38 = arith.constant 0 : index
    %c0_39 = arith.constant 0 : index
    %38 = vector.load %arg5[%c3_37, %c0_38, %c0_39] : memref<4x8x128xf32, #tpu.memory_space<vmem>>, vector<1x8x128xf32>
    %39 = vector.shape_cast %38 : vector<1x8x128xf32> to vector<8x128xf32>
    %cst_40 = arith.constant dense<0.000000e+00> : vector<8x128xf32>
    %40 = tpu.matmul %3, %37, %cst_40 {dimension_numbers = #tpu.dot_dimension_numbers<[1], [0], [0], [1], [0, 0, 1, 1], [], []>} : vector<8x16xf32>, vector<16x128xf32>, vector<8x128xf32> -> vector<8x128xf32>
    %41 = arith.addf %39, %40 : vector<8x128xf32>
    %c3_41 = arith.constant 3 : index
    %c0_42 = arith.constant 0 : index
    %c0_43 = arith.constant 0 : index
    %42 = vector.load %arg5[%c3_41, %c0_42, %c0_43] : memref<4x8x128xf32, #tpu.memory_space<vmem>>, vector<1x8x128xf32>
    %43 = vector.shape_cast %42 : vector<1x8x128xf32> to vector<8x128xf32>
    %44 = vector.shape_cast %41 : vector<8x128xf32> to vector<1x8x128xf32>
    tpu.vector_store %arg5[%c3_41, %c0_42, %c0_43], %44 {strides = array<i32>} : memref<4x8x128xf32, #tpu.memory_space<vmem>>, vector<1x8x128xf32>,
    return
  }
  func.func @transform_0(%arg0: i32, %arg1: i32) -> (i32, i32) {
    %c0_i32 = arith.constant 0 : i32
    %c0_i32_0 = arith.constant 0 : i32
    return %c0_i32, %arg1 : i32, i32
  }
  func.func @transform_1(%arg0: i32, %arg1: i32) -> (i32, i32) {
    %c0_i32 = arith.constant 0 : i32
    %c0_i32_0 = arith.constant 0 : i32
    %c0_i32_1 = arith.constant 0 : i32
    return %c0_i32, %c0_i32_0 : i32, i32
  }
  func.func @transform_2(%arg0: i32, %arg1: i32) -> (i32, i32, i32) {
    %c0_i32 = arith.constant 0 : i32
    %c0_i32_0 = arith.constant 0 : i32
    return %arg0, %arg1, %c0_i32 : i32, i32, i32
  }
  func.func @transform_3(%arg0: i32, %arg1: i32) -> (i32, i32, i32) {
    %c0_i32 = arith.constant 0 : i32
    %c0_i32_0 = arith.constant 0 : i32
    %c0_i32_1 = arith.constant 0 : i32
    return %arg0, %c0_i32, %c0_i32_0 : i32, i32, i32
  }
}

</mosaic_0001>

<bundles_post_ra>
// kernel: xray_resize.1
= control target key start
LH: loop header
LB: loop body
LE: loop exit
PB: predicated region body
PF: predicated region fallthrough
CT: control target
= control target key end

     0   :  { %8 = vsyncpa [#allocation3], 0  ;;  %s1745_s0 = inlined_call_operand.hbm [shape: f32[8,16], index: 0, kind: input, shape index: {}]   ;;  %s1746_s1 = inlined_call_operand.hbm [shape: f32[16,128], index: 1, kind: input, shape index: {}]   ;;  %s1747_s2 = inlined_call_operand.hbm [shape: f32[8,16,16], index: 2, kind: input, shape index: {}]   ;;  %s1748_s3 = inlined_call_operand.hbm [shape: f32[8,8,128], index: 3, kind: output, shape index: {}]  }
   0x1   :  { %9 = vsyncpa [#allocation6], 0 }
   0x2   :  { %10 = vsyncpa [#allocation4], 0 }
   0x3   :  { %12 = vsyncpa [#allocation4 + $0x1], 0  ;;  %s1463_s12 = smov 0   ;;  %s1465_s13 = smov 0  }
   0x4   :  { %s1467_s14 = smov 0   ;;  %s1469_s15 = smov 0  }
   0x5   :  { %s1471_s16 = smov 0   ;;  %s1473_s17 = smov 0  }
   0x6 LB: > { %s1494_s18 = sadd.s32 4294967295, %s1430_s17   ;;  %s1006_s19 = sadd.s32 4294967294, %s1430_s17   ;;  %s1430_s17 = sphi %s1473_s17, %s18_s17   ;;  %s1426_s16 = sphi %s1471_s16, %s1777_s16   ;;  %s1422_s15 = sphi %s1469_s15, %s1776_s15   ;;  %s1418_s14 = sphi %s1467_s14, %s1775_s14   ;;  %s1414_s13 = sphi %s1465_s13, %s1774_s13   ;;  %s1410_s12 = sphi %s1463_s12, %s1773_s12  }
   0x7   : > { %p93_p0 = scmp.ne.s32.totalorder %s1418_s14, %s1414_s13  ;;  %p94_p1 = scmp.eq.s32.totalorder %s1430_s17, 0 }
   0x8   : > { %p99_p2 = scmp.ne.s32.totalorder %s1414_s13, %s1410_s12  ;;  %p1749_p3 = scmp.eq.s32.totalorder %s1494_s18, 0 }
   0x9   : > { %p123_p4 = scmp.eq.s32.totalorder %s1494_s18, 1  ;;  %p1505_p5 = por %p94_p1, %p93_p0 }
   0xa   : > { %p129_p6 = scmp.eq.s32.totalorder %s1006_s19, 1  ;;  %p1511_p7 = por %p1749_p3, %p99_p2 }
   0xb   : > { %p1515_p8 = por %p123_p4, %p93_p0  ;;  %p1007_p10 = scmp.ge.s32.totalorder %s1430_s17, 1 }
   0xc   : > { %s1755_s22 = scalar_select %p1511_p7, 1, 0 }
   0xd   : > { %s1756_s23 = scalar_select %p1515_p8, 1, 0 }
   0xe   : > { %p1519_p9 = por %p129_p6, %p99_p2  ;;  %p136_p11 = scmp.lt.s32.totalorder %s1430_s17, 3 }
   0xf   : > { %s1432_s26 = smov [#allocation2]   ;;  %p1193_p1 = scmp.lt.s32.totalorder %s1430_s17, 2 }
  0x10   : > { %s1757_s24 = scalar_select %p1519_p9, 1, 0 }
  0x11   : > { %p1526_p13 = pnand %p1007_p10, %p136_p11  ;;  %s151_s27 = sshll.u32 %s1432_s26, 4  ;;  %s152_s27 = int_to_ptr.vmem [resolvable:$true] %s151_s27 }
  0x12   : > { %p1535_p4 = pnand %p1193_p1, %p1505_p5  ;;  %s1433_s29 = smov [#allocation5]  }
  0x13   : > { %s1758_s25 = scalar_select %p1526_p13, 1, 0 }
  0x14   : > { %p1176_p0 = pneg %p1526_p13  ;;  %s161_s30 = sshll.u32 %s1433_s29, 4  ;;  %s1545_s30 = int_to_ptr.vmem [resolvable:$true] %s161_s30 }
  0x15   : > { %s1759_s28 = scalar_select %p1535_p4, 1, 0 }
  0x16   : > { %p1541_p2 = pnand %p1176_p0, %p1749_p3  ;;  %s1254_s7 = scalar_lea.hbm %s1745_s0, 128 }
  0x17   : > { %p1255_p5 = scmp.ne.s32.totalorder %s1745_s0, %s1254_s7  ;;  %p1261_p1 = scmp.lt.u32.totalorder %s1254_s7, %s1745_s0 }
  0x18   : > { %p1256_p6 = pneg %p1541_p2 }
  0x1a   : > { %p1257_p10 = pnand %p1256_p6, %p1255_p5 }
  0x1c   : > { %p1258_p11 = pneg %p1257_p10 }
  0x1e   : > { %p1263_p0 = pnand %p1261_p1, %p1258_p11 }
  0x20   : > { %1266 = shalt.err (!%p1263_p0)
}
  0x21   : > { %s1267_s19 = scalar_lea.vmem %s152_s27, 128  ;;  %p1275_p8 = scmp.lt.s32.totalorder %s152_s27, %s152_s27 }
  0x22   : > { %p1268_p12 = scmp.ne.s32.totalorder %s152_s27, %s1267_s19  ;;  %p1276_p7 = scmp.lt.s32.totalorder %s1267_s19, %s1267_s19 }
  0x24   : > { %p1270_p3 = pnand %p1268_p12, %p1256_p6  ;;  %p1277_p13 = por %p1276_p7, %p1275_p8 }
  0x26   : > { %p1271_p9 = pneg %p1270_p3 }
  0x28   : > { %p1278_p4 = pnand %p1277_p13, %p1271_p9 }
  0x2a   : > { %1281 = shalt.err (!%p1278_p4)
}
  0x2b   : > { %1179 = dma.hbm_to_vmem [thread:$0]  (!%p1541_p2), %s1745_s0, 128, %s152_s27, [#allocation3]  }
  0x2c   : > { %s1282_s6 = scalar_lea.hbm %s1746_s1, 256 }
  0x2d   : > { %p1283_p3 = scmp.ne.s32.totalorder %s1746_s1, %s1282_s6  ;;  %p1289_p9 = scmp.lt.u32.totalorder %s1282_s6, %s1746_s1 }
  0x2f   : > { %p1285_p7 = pnand %p1283_p3, %p1256_p6 }
  0x31   : > { %p1286_p8 = pneg %p1285_p7 }
  0x33   : > { %p1291_p12 = pnand %p1289_p9, %p1286_p8 }
  0x35   : > { %1294 = shalt.err (!%p1291_p12)
}
  0x36   : > { %s1295_s27 = scalar_lea.vmem %s1545_s30, 256  ;;  %p1303_p10 = scmp.lt.s32.totalorder %s1545_s30, %s1545_s30 }
  0x37   : > { %p1296_p13 = scmp.ne.s32.totalorder %s1545_s30, %s1295_s27  ;;  %p1304_p11 = scmp.lt.s32.totalorder %s1295_s27, %s1295_s27 }
  0x39   : > { %p1298_p4 = pnand %p1296_p13, %p1256_p6  ;;  %p1305_p1 = por %p1304_p11, %p1303_p10 }
  0x3b   : > { %p1299_p5 = pneg %p1298_p4 }
  0x3d   : > { %p1306_p0 = pnand %p1305_p1, %p1299_p5 }
  0x3f   : > { %1309 = shalt.err (!%p1306_p0)
}
  0x40   : > { %s1434_s11 = smov 128   ;;  %s1435_s19 = smov 8  }
  0x41   : > { %1182 = dma.hbm_to_vmem [thread:$0]  (!%p1541_p2), %s1746_s1, 256, %s1545_s30, [#allocation6], %s1434_s11, %s1434_s11, %s1435_s19  }
  0x42   : > { %s175_s29 = sand.u32 1, %s1430_s17   ;;  %s30_s5 = sadd.s32 1, %s1426_s16 }
  0x43   : > { %s177_s6 = sand.u32 1, %s1418_s14   ;;  %p32_p6 = scmp.ge.s32.totalorder %s30_s5, 2 }
  0x44   : > { %s1011_s7 = sshll.u32 %s177_s6, 6  ;;  %s1050_s8 = sshll.u32 %s1426_s16, 10 }
  0x45   : > { %s1779_s5 = smov (%p32_p6, %s30_s5), 0  ;;  %s1606_s4 = scalar_lea.hbm %s1747_s2, %s1050_s8 }
  0x46   : > { %s179_s30 = scalar_lea.vmem [#allocation7], %s1011_s7  ;;  %s81_s21 = ssub.s32 %s1426_s16, %s1779_s5 }
  0x47   : > { %s189_s27 = sshll.u32 %s179_s30, 4  ;;  %p1612_p2 = scmp.eq.s32.totalorder %s81_s21, 0  ;;  %s1610_s27 = int_to_ptr.vmem [resolvable:$true] %s189_s27 }
  0x48   : > { %s1616_s6 = scalar_lea.sflag [#allocation3], %s175_s29  ;;  %s1310_s20 = scalar_lea.hbm %s1606_s4, 1024 }
  0x49   : > { %p1311_p3 = scmp.ne.s32.totalorder %s1606_s4, %s1310_s20  ;;  %p1762_p7 = scmp.ne.s32.totalorder %s1759_s28, 0 }
  0x4a   : > { %s1315_s9 = scalar_lea.hbm %s1747_s2, 2048  ;;  %p1316_p13 = scmp.lt.u32.totalorder %s1606_s4, %s1747_s2 }
  0x4b   : > { %p1312_p8 = pneg %p1762_p7  ;;  %p1317_p4 = scmp.lt.u32.totalorder %s1315_s9, %s1310_s20 }
  0x4c   : > { %p1319_p10 = scmp.lt.u32.totalorder %s1310_s20, %s1606_s4 }
  0x4d   : > { %p1313_p9 = pnand %p1312_p8, %p1311_p3  ;;  %p1318_p5 = por %p1317_p4, %p1316_p13 }
  0x4f   : > { %p1314_p12 = pneg %p1313_p9  ;;  %p1320_p11 = por %p1319_p10, %p1318_p5 }
  0x51   : > { %p1321_p1 = pnand %p1320_p11, %p1314_p12 }
  0x53   : > { %1324 = shalt.err (!%p1321_p1)
}
  0x54   : > { %s1325_s29 = scalar_lea.vmem %s1610_s27, 1024  ;;  %s1436_s21 = smov [#allocation7]  }
  0x55   : > { %p1326_p0 = scmp.ne.s32.totalorder %s1610_s27, %s1325_s29  ;;  %s1330_s8 = sshll.u32 %s1436_s21, 4  ;;  %s1331_s8 = int_to_ptr.vmem [resolvable:$false] %s1330_s8 }
  0x56   : > { %s1332_s7 = scalar_lea.vmem %s1331_s8, 2048  ;;  %p1333_p9 = scmp.lt.s32.totalorder %s1610_s27, %s1331_s8 }
  0x57   : > { %p1328_p6 = pnand %p1326_p0, %p1312_p8  ;;  %p1334_p13 = scmp.lt.s32.totalorder %s1332_s7, %s1325_s29 }
  0x59   : > { %p1329_p3 = pneg %p1328_p6  ;;  %p1335_p4 = por %p1334_p13, %p1333_p9 }
  0x5b   : > { %p1336_p5 = pnand %p1335_p4, %p1329_p3 }
  0x5d   : > { %1339 = shalt.err (!%p1336_p5)
}
  0x5e   : > { %1186 = dma.hbm_to_vmem [thread:$0]  (!%p1762_p7), %s1606_s4, 1024, %s1610_s27, %s1616_s6, %s1434_s11, %s1434_s11, %s1435_s19  }
  0x5f   : > { %s1763_s20 = sadd.s32 1, %s1418_s14  ;;  %p1764_p8 = scmp.ne.s32.totalorder %s1758_s25, 0 }
  0x60   : > { %s1652_s9 = scalar_select %p1612_p2, %s1418_s14, %s1763_s20  }
  0x61   : > { %201 = sbr.rel (%p1764_p8) target bundleno = 578 (0x242), region = 32  ;;  %p1765_p12 = scmp.eq.s32.totalorder (!%p1764_p8), %s1494_s18, 0 }
  0x68   : > { %1393 = dma.done.wait (%p1765_p12), [#allocation3], 128   ;;  %p1766_p10 = pmov %p1765_p12 }
  0x6a   : > { %1395 = vsyncadd (%p1766_p10), [#allocation3], 4294967168  ;;  %p1767_p11 = pmov %p1766_p10 }
  0x6b   : > { %p1768_p1 = pmov %p1766_p10 }
  0x6c   : > { %1397 = dma.done.wait (%p1767_p11), [#allocation6], 256  }
  0x6d   : > { %1399 = vsyncadd (%p1768_p1), [#allocation6], 4294967040  ;;  %s211_s28 = sand.u32 1, %s1494_s18   ;;  %s1666_s11 = sand.u32 1, %s1414_s13  }
  0x6e   : > { %s1018_s25 = sshll.u32 %s1666_s11, 6  ;;  %s212_s19 = scalar_lea.sflag [#allocation3], %s211_s28 }
  0x6f   : > { %s215_s4 = scalar_lea.vmem [#allocation7], %s1018_s25  ;;  %p1769_p2 = scmp.ne.s32.totalorder %s1755_s22, 0 }
  0x71   : > { %1401 = dma.done.wait (%p1769_p2), %s212_s19, 1024  }
  0x72   : > { %1403 = vsyncadd (%p1769_p2), %s212_s19, 4294966272  ;;  %vm254_vm0 = vcmask 130048   ;;  %v250_v0 = vld [vmem:[#allocation5] sm:$0xff]  ;;  %v251_v1 = vld [vmem:[#allocation5 + $0x8] sm:$0xff]  ;;  %v1437_v11 = vmov 0.0|0.0   ;;  %vm1438_vm1 = vmmov 0  }
  0x73   : > { %v252_v2 = vld [vmem:[%s215_s4] sm:$0xff]  ;;  %v1136_v3 = vpack.c.bf16 %v251_v1, %v250_v0  ;;  %v253_v4 = vld [vmem:[%s215_s4 + $0x8] sm:$0xff]  ;;  %v1023_v5 = vld [vmem:[%s215_s4 + $0x10] sm:$0xff]  ;;  %1140 = vmatprep.subr.bf16.mxu1 %v1437_v11  ;;  %v1439_v12 = vmov 0.0   ;;  %s1019_s18 = sshll.u32 %s1666_s11, 5  ;;  %s1051_s27 = sshll.u32 %s1422_s15, 9 }
  0x74   : > { %1084 = vmatprep.mubr.msk.f32.mxu0 %vm254_vm0, %v252_v2  ;;  %v1024_v6 = vld [vmem:[%s215_s4 + $0x18] sm:$0xff]  ;;  %v1030_v7 = vld [vmem:[%s215_s4 + $0x20] sm:$0xff]  ;;  %v1031_v8 = vld [vmem:[%s215_s4 + $0x28] sm:$0xff]  ;;  %1091 = vmatprep.mubr.msk.f32.mxu1 %vm1438_vm1, %v1439_v12  ;;  %s237_s22 = scalar_lea.vmem [#allocation8], %s1019_s18  ;;  %s1694_s30 = scalar_lea.hbm %s1748_s3, %s1051_s27 }
  0x75   : > { %1137 = vmatprep.subr.bf16.mxu0 %v1136_v3  ;;  %v1037_v9 = vld [vmem:[%s215_s4 + $0x30] sm:$0xff]  ;;  %v1038_v10 = vld [vmem:[%s215_s4 + $0x38] sm:$0xff]  ;;  %v249_v17 = vld [vmem:[#allocation2] sm:$0xff]  ;;  %s900_s26 = sshll.u32 %s237_s22, 4  ;;  %s887_s29 = scalar_lea.sflag [#allocation4], %s1666_s11  ;;  %s1696_s26 = int_to_ptr.vmem [resolvable:$true] %s900_s26 }
  0x76   : > { %1139 = vmatpush3.bf16.msra.mxu0 %v1136_v3  ;;  %s1340_s21 = scalar_lea.vmem %s1696_s26, 512  ;;  %p1770_p0 = scmp.ne.s32.totalorder %s1756_s23, 0 }
  0x77   : > { %1144 = vmatprep.subr.bf16.mxu0 %v1136_v3  ;;  %p1341_p7 = scmp.ne.s32.totalorder %s1696_s26, %s1340_s21  ;;  %s1440_s15 = smov [#allocation8]  }
  0x78   : > { %s1344_s8 = sshll.u32 %s1440_s15, 4  ;;  %s1345_s8 = int_to_ptr.vmem [resolvable:$false] %s1344_s8 }
  0x79   : > { %1085 = vmatmul.mubr.msk.f32.vlgmr.msra.gmra.mrb[0].mxu0 %vm254_vm0, %v253_v4  ;;  %p1342_p6 = pnand %p1341_p7, %p1770_p0  ;;  %s1346_s7 = scalar_lea.vmem %s1345_s8, 1024 }
  0x7a   : > { %1146 = vmatpush3.bf16.msra.mxu0 %v1136_v3  ;;  %1098 = vmatprep.mubr.msk.f32.mxu0 %vm254_vm0, %v1023_v5  ;;  %p1347_p9 = scmp.lt.s32.totalorder %s1696_s26, %s1345_s8  ;;  %p1348_p13 = scmp.lt.s32.totalorder %s1346_s7, %s1340_s21 }
  0x7b   : > { %1151 = vmatprep.subr.bf16.mxu0 %v1136_v3  ;;  %p1343_p3 = pneg %p1342_p6 }
  0x7c   : > { %p1349_p4 = por %p1348_p13, %p1347_p9 }
  0x7d   : > { %1099 = vmatmul.mubr.msk.f32.vlgmr.msra.gmra.mrb[2].mxu0 %vm254_vm0, %v1024_v6 }
  0x7e   : > { %1153 = vmatpush3.bf16.msra.mxu0 %v1136_v3  ;;  %1112 = vmatprep.mubr.msk.f32.mxu0 %vm254_vm0, %v1030_v7  ;;  %p1350_p5 = pnand %p1349_p4, %p1343_p3 }
  0x7f   : > { %1158 = vmatprep.subr.bf16.mxu0 %v1136_v3 }
  0x81   : > { %1113 = vmatmul.mubr.msk.f32.vlgmr.msra.gmra.mrb[4].mxu0 %vm254_vm0, %v1031_v8 }
  0x82   : > { %1160 = vmatpush3.bf16.msra.mxu0 %v1136_v3  ;;  %1126 = vmatprep.mubr.msk.f32.mxu0 %vm254_vm0, %v1037_v9 }
  0x85   : > { %1127 = vmatmul.mubr.msk.f32.vlgmr.msra.gmra.mrb[6].mxu0 %vm254_vm0, %v1038_v10 }
 0x14c   : > { %v1086_v13 = vpop.f32.mrb[0].mxu0 }
 0x14d   : > { %v327_v14 = vpop.f32.mrb[1].mxu0 }
 0x14e   : > { %v1141_v15 = vpack.c.bf16 %v1086_v13, %v327_v14 }
 0x150   : > { %1142 = vmatpush3.bf16.msra.mxu1 %v1141_v15  ;;  %v1100_v16 = vpop.f32.mrb[2].mxu0 }
 0x151   : > { %v487_v18 = vpop.f32.mrb[3].mxu0  ;;  %1147 = vmatprep.subr.bf16.mxu1 %v1437_v11 }
 0x152   : > { %v1148_v19 = vpack.c.bf16 %v1100_v16, %v487_v18 }
 0x153   : > { %1092 = vmatmul.mubr.msk.f32.vlgmr.msra.gmra.mrb[0].mxu1 %vm254_vm0, %v249_v17 }
 0x154   : > { %1149 = vmatpush3.bf16.msra.mxu1 %v1148_v19  ;;  %v1114_v20 = vpop.f32.mrb[4].mxu0  ;;  %1105 = vmatprep.mubr.msk.f32.mxu1 %vm1438_vm1, %v1439_v12 }
 0x155   : > { %v645_v21 = vpop.f32.mrb[5].mxu0  ;;  %1154 = vmatprep.subr.bf16.mxu1 %v1437_v11 }
 0x156   : > { %v1155_v22 = vpack.c.bf16 %v1114_v20, %v645_v21 }
 0x157   : > { %1106 = vmatmul.mubr.msk.f32.vlgmr.msra.gmra.mrb[2].mxu1 %vm254_vm0, %v249_v17 }
 0x158   : > { %1156 = vmatpush3.bf16.msra.mxu1 %v1155_v22  ;;  %v1128_v23 = vpop.f32.mrb[6].mxu0  ;;  %1119 = vmatprep.mubr.msk.f32.mxu1 %vm1438_vm1, %v1439_v12 }
 0x159   : > { %v803_v24 = vpop.f32.mrb[7].mxu0  ;;  %1161 = vmatprep.subr.bf16.mxu1 %v1437_v11 }
 0x15a   : > { %v1162_v25 = vpack.c.bf16 %v1128_v23, %v803_v24 }
 0x15b   : > { %1120 = vmatmul.mubr.msk.f32.vlgmr.msra.gmra.mrb[4].mxu1 %vm254_vm0, %v249_v17 }
 0x15c   : > { %1163 = vmatpush3.bf16.msra.mxu1 %v1162_v25  ;;  %1133 = vmatprep.mubr.msk.f32.mxu1 %vm1438_vm1, %v1439_v12 }
 0x15f   : > { %1134 = vmatmul.mubr.msk.f32.vlgmr.msra.gmra.mrb[6].mxu1 %vm254_vm0, %v249_v17 }
 0x226   : > { %v406_v26 = vpop.f32.mrb[0].mxu1 }
 0x227   : > { %v1093_v27 = vpop.f32.mrb[1].mxu1  ;;  %411 = vst [vmem:[%s237_s22] sm:$0xff] %v406_v26 }
 0x22a   : > { %v564_v28 = vpop.f32.mrb[2].mxu1 }
 0x22b   : > { %v1107_v29 = vpop.f32.mrb[3].mxu1  ;;  %1029 = vst [vmem:[%s237_s22 + $0x8] sm:$0xff] %v564_v28 }
 0x22e   : > { %v722_v30 = vpop.f32.mrb[4].mxu1 }
 0x22f   : > { %v1121_v31 = vpop.f32.mrb[5].mxu1  ;;  %1036 = vst [vmem:[%s237_s22 + $0x10] sm:$0xff] %v722_v30 }
 0x232   : > { %v880_v32 = vpop.f32.mrb[6].mxu1 }
 0x233   : > { %v1135_v33 = vpop.f32.mrb[7].mxu1  ;;  %1043 = vst [vmem:[%s237_s22 + $0x18] sm:$0xff] %v880_v32 }
 0x234   : > { %1353 = shalt.err (!%p1350_p5)
}
 0x235   : > { %s1354_s20 = scalar_lea.hbm %s1694_s30, 512  ;;  %s1358_s19 = scalar_lea.hbm %s1748_s3, 1024 }
 0x236   : > { %p1355_p8 = scmp.ne.s32.totalorder %s1694_s30, %s1354_s20  ;;  %p1359_p11 = scmp.lt.u32.totalorder %s1694_s30, %s1748_s3 }
 0x237   : > { %p1360_p1 = scmp.lt.u32.totalorder %s1358_s19, %s1354_s20  ;;  %p1362_p7 = scmp.lt.u32.totalorder %s1354_s20, %s1694_s30 }
 0x238   : > { %p1356_p12 = pnand %p1355_p8, %p1770_p0 }
 0x239   : > { %p1361_p2 = por %p1360_p1, %p1359_p11 }
 0x23a   : > { %p1357_p10 = pneg %p1356_p12 }
 0x23b   : > { %p1363_p6 = por %p1362_p7, %p1361_p2 }
 0x23d   : > { %p1364_p3 = pnand %p1363_p6, %p1357_p10 }
 0x23f   : > { %1367 = shalt.err (!%p1364_p3)
}
 0x240   : > { %s1441_s22 = smov 128   ;;  %s1442_s27 = smov 8  }
 0x241   : > { %1174 = dma.vmem_to_hbm [thread:$0]  (%p1770_p0), %s1696_s26, 512, %s1694_s30, %s887_s29, %s1441_s22, %s1441_s22, %s1442_s27  }
 0x242 PF: > { %s915_s6 = sand.u32 1, %s1410_s12   ;;  %p1771_p9 = scmp.ne.s32.totalorder %s1757_s24, 0 }
 0x243   : > { %p1772_p13 = scmp.ge.s32.totalorder %s1430_s17, 2  ;;  %s916_s10 = scalar_lea.sflag [#allocation4], %s915_s6 }
 0x245   : > { %p1188_p4 = pnand %p1772_p13, %p1771_p9 }
 0x247   : > { %1405 = dma.done.wait (!%p1188_p4), %s916_s10, 512  }
 0x248   : > { %1407 = vsyncadd (!%p1188_p4), %s916_s10, 4294966784  ;;  %s18_s17 = sadd.s32 1, %s1430_s17   ;;  %s1773_s12 = smov %s1414_s13 }
 0x249   : > { %p15_p5 = scmp.ge.s32.totalorder %s18_s17, 4   ;;  %s1774_s13 = smov %s1418_s14 }
 0x24a   : > { %s1775_s14 = smov %s1652_s9  ;;  %s1776_s15 = smov %s1426_s16 }
 0x24b   : > { %s1777_s16 = smov %s1779_s5  ;;  %17 = sbr.rel (!%p15_p5) target bundleno = 6 (0x6), region = 95 }
 0x252   :  { %921 = vsyncpa [#allocation3], 1 }
 0x253   :  { %923 = vsyncpa [#allocation3 + $0x1], 1 }
 0x254   :  { %924 = vsyncpa [#allocation6], 1 }
 0x255   :  { %925 = vsyncpa [#allocation4], 1 }
 0x256   :  { %927 = vsyncpa [#allocation4 + $0x1], 1 }

</bundles_post_ra>
